<compile_context>
chip_gen: v7x
topology: tpu7x:2x2x1
jax: 0.10.0
libtpu: 0.0.40
codegen_flags: <defaults>
</compile_context>

<pallas_src>
import functools

import jax
import jax.numpy as jnp
from jax.experimental import pallas as pl
from jax.experimental.pallas import tpu as pltpu

EPS = 1.0 / 1024.0
MOM = 7.0 / 8.0


def _vmem_capacity_bytes():
    """Physical VMEM capacity; conservative (v7x-sized) fallback if unknown."""
    try:
        cap = getattr(pltpu.get_tpu_info(), "vmem_capacity_bytes", None)
        if cap:
            return int(cap)
    except Exception:
        pass
    return 64 * 1024 * 1024


def _pick_tiles(n, c, m, elem_bytes, block_budget):
    """Choose (nb, tm, grid_t, need_mask).

    tm: multiple of 128 (or full extent when m < 128), sized from bytes so a
        (nb, c, tm) block stays within block_budget.  Prefers a tm that divides
        m; otherwise the last block is partial and the stats kernel masks it.
    nb: number of batch elements per block (divisor of n, keep >= 2 batch
        blocks so a "parallel" N axis can still be sharded across TCs).
    """
    if m <= 128:
        tm = m
    else:
        max_lanes = max(128, (block_budget // max(1, c * elem_bytes)) // 128 * 128)
        cap = min(max_lanes, (m // 128) * 128)
        tm = None
        k = cap
        while k >= 128:
            if m % k == 0:
                tm = k
                break
            k -= 128
        if tm is None:
            tm = cap                       # non-dividing: tail block masked
    t = -(-m // tm)
    need_mask = (m % tm) != 0

    block_bytes = c * tm * elem_bytes
    nb = 1
    for cand in range(2, n + 1):
        if n % cand != 0:
            continue
        if n // cand < 2:                  # keep >= 2 batch blocks (megacore)
            continue
        if cand * block_bytes <= block_budget:
            nb = cand
    return nb, tm, t, need_mask


# ---------------------------------------------------------------------------
# Kernels
# ---------------------------------------------------------------------------

def _bn_stats_kernel(x_ref, sum_ref, sumsq_ref, acc_s, acc_q, *,
                     m_total, tm, need_mask):
    """Per-batch-block, per-channel sum / sum-of-squares.

    Grid: (batch blocks [parallel], M tiles [arbitrary]).  Per-step work is
    pure VPU adds into lane-dense (C, tm) f32 scratch; the cross-lane reduce
    to (C, 1) runs once per batch block on the last M tile.
    """
    j = pl.program_id(1)

    @pl.when(j == 0)
    def _init():
        acc_s[...] = jnp.zeros_like(acc_s)
        acc_q[...] = jnp.zeros_like(acc_q)

    x = x_ref[...].astype(jnp.float32)                     # (nb, c, tm)
    if need_mask:                                          # tail M tile only exists
        col = jax.lax.broadcasted_iota(jnp.int32, x.shape, x.ndim - 1)
        x = jnp.where(col + j * tm < m_total, x, 0.0)
    acc_s[...] += jnp.sum(x, axis=0)                       # (c, tm)  VPU adds
    acc_q[...] += jnp.sum(x * x, axis=0)

    @pl.when(j == pl.num_programs(1) - 1)
    def _finalize():
        sum_ref[...] = jnp.sum(acc_s[...], axis=1, keepdims=True)[None]     # (1,c,1)
        sumsq_ref[...] = jnp.sum(acc_q[...], axis=1, keepdims=True)[None]


def _bn_scale_shift_kernel(x_ref, scale_ref, shift_ref, y_ref):
    """y = x * scale + shift with pre-folded per-channel (C, 1) scale/shift."""
    x = x_ref[...]                                         # (nb, c, tm)
    sc = scale_ref[...][None]                              # (1, c, 1)
    sh = shift_ref[...][None]
    y_ref[...] = (x * sc + sh).astype(y_ref.dtype)


def _bn_fused_train_kernel(x_ref, gamma_ref, beta_ref, y_ref, mean_ref, std_ref,
                           *, eps):
    """Whole tensor resident in VMEM: 1 HBM read + 1 HBM write, centered var."""
    x = x_ref[...].astype(jnp.float32)                     # (n, c, m)
    inv_total = 1.0 / float(x.shape[0] * x.shape[2])
    mean = jnp.sum(jnp.sum(x, axis=0), axis=-1, keepdims=True) * inv_total   # (c,1)
    ctr = x - mean[None]
    var = jnp.sum(jnp.sum(ctr * ctr, axis=0), axis=-1, keepdims=True) * inv_total
    std = jnp.sqrt(var + eps)
    scale = gamma_ref[...].astype(jnp.float32) / std                          # (c,1)
    y_ref[...] = (ctr * scale[None]
                  + beta_ref[...].astype(jnp.float32)[None]).astype(y_ref.dtype)
    mean_ref[...] = mean
    std_ref[...] = std


# ---------------------------------------------------------------------------
# Wrapper
# ---------------------------------------------------------------------------

def batchnorm_nd_forward(x, gamma, beta, mov_mean, mov_std, is_t,
                         mom=MOM, eps=EPS, fused_threshold_bytes=None):
    """Forward pass of BatchNormNd.

    x: (N, C, *spatial).  gamma/beta/mov_mean/mov_std: (C, 1).
    Returns (y, new_mov_mean, new_mov_std).
    """
    n, c = x.shape[0], x.shape[1]
    m = 1
    for d in x.shape[2:]:
        m *= d
    x3 = x.reshape(n, c, m)                 # free view: no transpose, no HBM pass

    capacity = _vmem_capacity_bytes()
    vmem_limit = min(64 * 1024 * 1024, capacity // 2)
    block_budget = max(512 * 1024, min(4 * 1024 * 1024, vmem_limit // 16))

    gamma32 = gamma.astype(jnp.float32)
    beta32 = beta.astype(jnp.float32)

    if fused_threshold_bytes is None:
        fused_threshold_bytes = capacity // 8
    x_f32_bytes = n * c * m * 4

    # ---- Fused single-pass training path (tensor fits in VMEM) ----
    if is_t and x_f32_bytes <= fused_threshold_bytes:
        fused_limit = min(capacity * 3 // 4,
                          max(vmem_limit, 6 * x_f32_bytes + (4 << 20)))
        y3, x_mean, x_std = pl.pallas_call(
            functools.partial(_bn_fused_train_kernel, eps=float(eps)),
            out_shape=(jax.ShapeDtypeStruct((n, c, m), x.dtype),
                       jax.ShapeDtypeStruct((c, 1), jnp.float32),
                       jax.ShapeDtypeStruct((c, 1), jnp.float32)),
            in_specs=[pl.BlockSpec(memory_space=pltpu.MemorySpace.VMEM)] * 3,
            out_specs=(pl.BlockSpec(memory_space=pltpu.MemorySpace.VMEM),) * 3,
            compiler_params=pltpu.CompilerParams(vmem_limit_bytes=int(fused_limit)),
        )(x3, gamma32, beta32)
        new_mov_mean = mom * mov_mean + (1.0 - mom) * x_mean
        new_mov_std = mom * mov_std + (1.0 - mom) * x_std
        return y3.reshape(x.shape), new_mov_mean, new_mov_std

    # ---- Tiled path ----
    elem_bytes = jnp.dtype(x.dtype).itemsize
    nb, tm, t, need_mask = _pick_tiles(n, c, m, elem_bytes, block_budget)
    gi = n // nb

    x_spec = pl.BlockSpec((nb, c, tm), lambda i, j: (i, 0, j))
    c1_in_spec = pl.BlockSpec((c, 1), lambda i, j: (0, 0))

    if is_t:
        # Pass 1: per-batch-block partial sums (N axis parallel -> megacore).
        part_spec = pl.BlockSpec((1, c, 1), lambda i, j: (i, 0, 0))
        x_sum_p, x_sumsq_p = pl.pallas_call(
            functools.partial(_bn_stats_kernel, m_total=m, tm=tm,
                              need_mask=need_mask),
            grid=(gi, t),
            in_specs=[x_spec],
            out_specs=(part_spec, part_spec),
            out_shape=(jax.ShapeDtypeStruct((gi, c, 1), jnp.float32),
                       jax.ShapeDtypeStruct((gi, c, 1), jnp.float32)),
            scratch_shapes=[pltpu.VMEM((c, tm), jnp.float32),
                            pltpu.VMEM((c, tm), jnp.float32)],
            compiler_params=pltpu.CompilerParams(
                dimension_semantics=("parallel", "arbitrary"),
                vmem_limit_bytes=int(vmem_limit)),
        )(x3)

        # O(gi*C) finalization + moving-average update in the wrapper.
        x_sum = jnp.sum(x_sum_p, axis=0)                   # (c, 1)
        x_sumsq = jnp.sum(x_sumsq_p, axis=0)
        inv_total = 1.0 / float(n * m)
        x_mean = x_sum * inv_total
        # TODO(synk): E[x^2]-mean^2 can cancel for |mean| >> std at very large
        # N*M; per-batch-block partials reduce (but do not eliminate) the risk.
        x_var = jnp.maximum(x_sumsq * inv_total - x_mean * x_mean, 0.0)
        x_std = jnp.sqrt(x_var + eps)
        scale = gamma32 / x_std
        shift = beta32 - x_mean * scale
        new_mov_mean = mom * mov_mean + (1.0 - mom) * x_mean
        new_mov_std = mom * mov_std + (1.0 - mom) * x_std
    else:
        scale = gamma32 / mov_std.astype(jnp.float32)
        shift = beta32 - mov_mean.astype(jnp.float32) * scale
        new_mov_mean = mov_mean
        new_mov_std = mov_std

    # Pass 2 (train) / single pass (eval): elementwise normalize + affine.
    y3 = pl.pallas_call(
        _bn_scale_shift_kernel,
        grid=(gi, t),
        in_specs=[x_spec, c1_in_spec, c1_in_spec],
        out_specs=x_spec,
        out_shape=jax.ShapeDtypeStruct((n, c, m), x.dtype),
        compiler_params=pltpu.CompilerParams(
            dimension_semantics=("parallel", "parallel"),
            vmem_limit_bytes=int(vmem_limit)),
    )(x3, scale, shift)

    return y3.reshape(x.shape), new_mov_mean, new_mov_std


# ---------------------------------------------------------------------------
# Pure-JAX reference mirroring the PyTorch module exactly.
# ---------------------------------------------------------------------------

def _reference_forward(x, gamma, beta, mov_mean, mov_std, is_t, mom=MOM, eps=EPS):
    c = x.shape[1]
    perm = (1, 0) + tuple(range(2, x.ndim))
    x_t = jnp.transpose(x, perm)
    s = x_t.shape
    x2d = x_t.reshape(c, -1)
    if is_t:
        x_mean = x2d.mean(1, keepdims=True)
        x_ctr = x2d - x_mean
        x_var = (x_ctr ** 2).mean(1, keepdims=True)
        x_std = jnp.sqrt(x_var + eps)
        x_norm = x_ctr / x_std
        new_mean = mom * mov_mean + (1 - mom) * x_mean
        new_std = mom * mov_std + (1 - mom) * x_std
    else:
        x_norm = (x2d - mov_mean) / mov_std
        new_mean, new_std = mov_mean, mov_std
    y = x_norm * gamma + beta
    y = jnp.transpose(y.reshape(s), perm)
    return y, new_mean, new_std


if __name__ == "__main__":
    key = jax.random.PRNGKey(0)
    k1, k2 = jax.random.split(key)

    # Case 1: small feature map -> fused single-pass training path.
    N, C, H, W = 2, 4, 16, 16
    x = jax.random.normal(k1, (N, C, H, W), dtype=jnp.float32)
    gamma = jnp.ones((C, 1), jnp.float32)
    beta = jnp.zeros((C, 1), jnp.float32)
    mov_mean = jnp.zeros((C, 1), jnp.float32)
    mov_std = jnp.ones((C, 1), jnp.float32)

    y, new_mean, new_std = batchnorm_nd_forward(
        x, gamma, beta, mov_mean, mov_std, is_t=True)
    jax.block_until_ready((y, new_mean, new_std))
    y_ref, mean_ref, std_ref = _reference_forward(
        x, gamma, beta, mov_mean, mov_std, is_t=True)
    assert y.shape == (N, C, H, W)
    assert jnp.allclose(y, y_ref, atol=1e-5, rtol=1e-5)
    assert jnp.allclose(new_mean, mean_ref, atol=1e-5, rtol=1e-5)
    assert jnp.allclose(new_std, std_ref, atol=1e-5, rtol=1e-5)

    # Eval mode with the updated running stats (tiled elementwise kernel).
    y_eval, _, _ = batchnorm_nd_forward(
        x, gamma, beta, new_mean, new_std, is_t=False)
    jax.block_until_ready(y_eval)
    y_eval_ref, _, _ = _reference_forward(
        x, gamma, beta, new_mean, new_std, is_t=False)
    assert jnp.allclose(y_eval, y_eval_ref, atol=1e-5, rtol=1e-5)

    # Case 2: force the tiled two-pass path -- exercises batch blocking (nb=2)
    # and a non-128-divisible spatial extent (M=400 -> tail masking in stats,
    # masked boundary writes in the elementwise pass).
    N2, C2, H2, W2 = 4, 4, 20, 20
    x2 = jax.random.normal(k2, (N2, C2, H2, W2), dtype=jnp.float32)
    gamma2 = jnp.full((C2, 1), 1.5, jnp.float32)
    beta2 = jnp.full((C2, 1), -0.25, jnp.float32)
    mm2 = jnp.zeros((C2, 1), jnp.float32)
    ms2 = jnp.ones((C2, 1), jnp.float32)

    y2, nm2, ns2 = batchnorm_nd_forward(
        x2, gamma2, beta2, mm2, ms2, is_t=True, fused_threshold_bytes=0)
    jax.block_until_ready((y2, nm2, ns2))
    y2_ref, nm2_ref, ns2_ref = _reference_forward(
        x2, gamma2, beta2, mm2, ms2, is_t=True)
    assert jnp.allclose(y2, y2_ref, atol=1e-4, rtol=1e-4)
    assert jnp.allclose(nm2, nm2_ref, atol=1e-5, rtol=1e-5)
    assert jnp.allclose(ns2, ns2_ref, atol=1e-5, rtol=1e-5)

    y2_eval, _, _ = batchnorm_nd_forward(
        x2, gamma2, beta2, nm2, ns2, is_t=False, fused_threshold_bytes=0)
    jax.block_until_ready(y2_eval)
    y2_eval_ref, _, _ = _reference_forward(
        x2, gamma2, beta2, nm2, ns2, is_t=False)
    assert jnp.allclose(y2_eval, y2_eval_ref, atol=1e-5, rtol=1e-5)

    print("KERNEL_OK")
</pallas_src>

<mosaic_0001>
module attributes {stable_mosaic.version = 11 : i64} {
  func.func @_bn_fused_train_kernel(%arg0: memref<2x4x256xf32, #tpu.memory_space<vmem>>, %arg1: memref<4x1xf32, #tpu.memory_space<vmem>>, %arg2: memref<4x1xf32, #tpu.memory_space<vmem>>, %arg3: memref<2x4x256xf32, #tpu.memory_space<vmem>>, %arg4: memref<4x1xf32, #tpu.memory_space<vmem>>, %arg5: memref<4x1xf32, #tpu.memory_space<vmem>>) attributes {dimension_semantics = [], scalar_prefetch = 0 : i64, scratch_operands = 0 : i64, tpu.core_type = #tpu.core_type<tc>} {
    %c0 = arith.constant 0 : index
    %c0_0 = arith.constant 0 : index
    %c0_1 = arith.constant 0 : index
    %0 = vector.load %arg0[%c0, %c0_0, %c0_1] : memref<2x4x256xf32, #tpu.memory_space<vmem>>, vector<2x4x256xf32>
    %cst = arith.constant dense<0.000000e+00> : vector<4x256xf32>
    %1 = vector.multi_reduction <add>, %0, %cst [0] : vector<2x4x256xf32> to vector<4x256xf32>
    %cst_2 = arith.constant dense<0.000000e+00> : vector<4xf32>
    %2 = vector.multi_reduction <add>, %1, %cst_2 [1] : vector<4x256xf32> to vector<4xf32>
    %3 = vector.shape_cast %2 : vector<4xf32> to vector<4x1xf32>
    %cst_3 = arith.constant 0.001953125 : f32
    %4 = vector.broadcast %cst_3 : f32 to vector<4x1xf32>
    %5 = arith.mulf %3, %4 : vector<4x1xf32>
    %6 = vector.shape_cast %5 : vector<4x1xf32> to vector<1x4x1xf32>
    %7 = vector.broadcast %6 : vector<1x4x1xf32> to vector<2x4x256xf32>
    %8 = arith.subf %0, %7 : vector<2x4x256xf32>
    %9 = arith.mulf %8, %8 : vector<2x4x256xf32>
    %cst_4 = arith.constant dense<0.000000e+00> : vector<4x256xf32>
    %10 = vector.multi_reduction <add>, %9, %cst_4 [0] : vector<2x4x256xf32> to vector<4x256xf32>
    %cst_5 = arith.constant dense<0.000000e+00> : vector<4xf32>
    %11 = vector.multi_reduction <add>, %10, %cst_5 [1] : vector<4x256xf32> to vector<4xf32>
    %12 = vector.shape_cast %11 : vector<4xf32> to vector<4x1xf32>
    %cst_6 = arith.constant 0.001953125 : f32
    %13 = vector.broadcast %cst_6 : f32 to vector<4x1xf32>
    %14 = arith.mulf %12, %13 : vector<4x1xf32>
    %cst_7 = arith.constant 9.765625E-4 : f32
    %15 = vector.broadcast %cst_7 : f32 to vector<4x1xf32>
    %16 = arith.addf %14, %15 : vector<4x1xf32>
    %17 = math.sqrt %16 : vector<4x1xf32>
    %c0_8 = arith.constant 0 : index
    %c0_9 = arith.constant 0 : index
    %18 = vector.load %arg1[%c0_8, %c0_9] : memref<4x1xf32, #tpu.memory_space<vmem>>, vector<4x1xf32>
    %19 = arith.divf %18, %17 : vector<4x1xf32>
    %20 = vector.shape_cast %19 : vector<4x1xf32> to vector<1x4x1xf32>
    %21 = vector.broadcast %20 : vector<1x4x1xf32> to vector<2x4x256xf32>
    %22 = arith.mulf %8, %21 : vector<2x4x256xf32>
    %c0_10 = arith.constant 0 : index
    %c0_11 = arith.constant 0 : index
    %23 = vector.load %arg2[%c0_10, %c0_11] : memref<4x1xf32, #tpu.memory_space<vmem>>, vector<4x1xf32>
    %24 = vector.shape_cast %23 : vector<4x1xf32> to vector<1x4x1xf32>
    %25 = vector.broadcast %24 : vector<1x4x1xf32> to vector<2x4x256xf32>
    %26 = arith.addf %22, %25 : vector<2x4x256xf32>
    %c0_12 = arith.constant 0 : index
    %c0_13 = arith.constant 0 : index
    %c0_14 = arith.constant 0 : index
    %27 = vector.load %arg3[%c0_12, %c0_13, %c0_14] : memref<2x4x256xf32, #tpu.memory_space<vmem>>, vector<2x4x256xf32>
    tpu.vector_store %arg3[%c0_12, %c0_13, %c0_14], %26 {strides = array<i32>} : memref<2x4x256xf32, #tpu.memory_space<vmem>>, vector<2x4x256xf32>,
    %c0_15 = arith.constant 0 : index
    %c0_16 = arith.constant 0 : index
    %28 = vector.load %arg4[%c0_15, %c0_16] : memref<4x1xf32, #tpu.memory_space<vmem>>, vector<4x1xf32>
    tpu.vector_store %arg4[%c0_15, %c0_16], %5 {strides = array<i32>} : memref<4x1xf32, #tpu.memory_space<vmem>>, vector<4x1xf32>,
    %c0_17 = arith.constant 0 : index
    %c0_18 = arith.constant 0 : index
    %29 = vector.load %arg5[%c0_17, %c0_18] : memref<4x1xf32, #tpu.memory_space<vmem>>, vector<4x1xf32>
    tpu.vector_store %arg5[%c0_17, %c0_18], %17 {strides = array<i32>} : memref<4x1xf32, #tpu.memory_space<vmem>>, vector<4x1xf32>,
    return
  }
}

</mosaic_0001>

<bundles_post_ra>
// kernel: tpu_custom_call.1
= control target key start
LH: loop header
LB: loop body
LE: loop exit
PB: predicated region body
PF: predicated region fallthrough
CT: control target
= control target key end

     0   :  { %11 = vsyncpa [#allocation3], 0  ;;  %s308_s0 = inlined_call_operand.hbm [shape: f32[2,4,256], index: 0, kind: input, shape index: {}]   ;;  %s309_s1 = inlined_call_operand.vmem [shape: f32[4,1], index: 1, kind: input, shape index: {}]   ;;  %s310_s2 = inlined_call_operand.vmem [shape: f32[4,1], index: 2, kind: input, shape index: {}]   ;;  %s311_s3 = inlined_call_operand.hbm [shape: f32[2,4,256], index: 3, kind: output, shape index: {0}]   ;;  %s312_s4 = inlined_call_operand.vmem [shape: f32[4,1], index: 4, kind: output, shape index: {1}]   ;;  %s313_s5 = inlined_call_operand.vmem [shape: f32[4,1], index: 5, kind: output, shape index: {2}]  }
   0x1   :  { %12 = vsyncpa [#allocation4], 0  ;;  %s216_s18 = smov [#allocation2]   ;;  %s168_s22 = scalar_lea.hbm %s308_s0, 256 }
   0x2   :  { %s18_s19 = sshll.u32 %s216_s18, 4  ;;  %p169_p0 = scmp.ne.s32.totalorder %s308_s0, %s168_s22  ;;  %s19_s19 = int_to_ptr.vmem [resolvable:$true] %s18_s19 }
   0x3   :  { %p172_p1 = scmp.lt.u32.totalorder %s168_s22, %s308_s0 }
   0x5   :  { %p174_p2 = pnand %p172_p1, %p169_p0 }
   0x7   :  { %177 = shalt.err (!%p174_p2)
}
   0x8   :  { %s178_s27 = scalar_lea.vmem %s19_s19, 256  ;;  %p183_p4 = scmp.lt.s32.totalorder %s19_s19, %s19_s19 }
   0x9   :  { %p179_p3 = scmp.ne.s32.totalorder %s19_s19, %s178_s27  ;;  %p184_p5 = scmp.lt.s32.totalorder %s178_s27, %s178_s27 }
   0xb   :  { %p185_p6 = por %p184_p5, %p183_p4 }
   0xd   :  { %p186_p7 = pnand %p185_p6, %p179_p3 }
   0xf   :  { %189 = shalt.err (!%p186_p7)
}
  0x10   :  { %s217_s28 = smov 128   ;;  %s218_s29 = smov 8  }
  0x11   :  { %24 = dma.hbm_to_vmem [thread:$0]  %s308_s0, 256, %s19_s19, [#allocation3], %s217_s28, %s217_s28, %s218_s29  }
  0x12   :  { %212 = dma.done.wait [#allocation3], 256  }
  0x13   :  { %213 = vsyncadd [#allocation3], 4294967040  ;;  %vm40_vm0 = vcmask 1043456   ;;  %v32_v0 = vld [vmem:[#allocation2] sm:$0xff]  ;;  %v33_v1 = vld [vmem:[#allocation2 + $0x8] sm:$0xff]  ;;  %v57_v15 = vlaneseq  ;;  %vm126_vm1 = vcmask 3072  }
  0x14   :  { %v36_v2 = vcombine.high %v32_v0, %v32_v0  ;;  %v37_v3 = vcombine.high %v33_v1, %v33_v1  ;;  %v41_v4 = vsel %vm40_vm0, %v32_v0, 0.0  ;;  %v42_v5 = vsel %vm40_vm0, %v33_v1, 0.0  ;;  %v92_v46 = vld [vmem:[%s309_s1] sm:$0xf]  ;;  %s221_s13 = smov [#allocation5]  }
  0x15   :  { %v43_v6 = vadd.f32 %v42_v5, %v41_v4  ;;  %v219_v13 = vmov 839922192   ;;  %v58_v17 = vshrl.u32 %v57_v15, 7  ;;  %v220_v37 = vmov 0   ;;  %v109_v49 = vld [vmem:[%s310_s2] sm:$0xf] }
  0x16   :  { %v44_v7 = vsel %vm40_vm0, %v36_v2, 0.0  ;;  %v45_v8 = vsel %vm40_vm0, %v37_v3, 0.0  ;;  %v55_v14 = vunpack.c.l.s4 %v219_v13  ;;  %160 = vset.pattern.permute.xlu1 %v220_v37  ;;  %161 = vset.pattern.permute.xlu0 %v220_v37  ;;  %s134_s14 = sshll.u32 %s221_s13, 4  ;;  %s135_s14 = int_to_ptr.vmem [resolvable:$true] %s134_s14 }
  0x17   :  { %v46_v9 = vadd.f32 %v45_v8, %v44_v7  ;;  %v47_v10 = vsel %vm40_vm0, %v43_v6, 0.0  ;;  %s190_s1 = scalar_lea.vmem %s135_s14, 256  ;;  %p195_p9 = scmp.lt.s32.totalorder %s135_s14, %s135_s14 }
  0x18   :  { %v56_v16 = vunpack.c.0.s8 %v55_v14  ;;  %p191_p8 = scmp.ne.s32.totalorder %s135_s14, %s190_s1  ;;  %p196_p10 = scmp.lt.s32.totalorder %s190_s1, %s190_s1 }
  0x19   :  { %v48_v11 = vsel %vm40_vm0, %v46_v9, 0.0 }
  0x1a   :  { %v49_v12 = vadd.f32 %v48_v11, %v47_v10  ;;  %v59_v18 = vsub.s32 %v56_v16, %v58_v17  ;;  %p197_p11 = por %p196_p10, %p195_p9 }
  0x1c   :  { %50 = vadd.xlane.f32.xlu0 %v49_v12  ;;  %p198_p12 = pnand %p197_p11, %p191_p8 }
  0xa9   :  { %v51_v19 = vpop.xlane.xlu0 %50 }
  0xaa   :  { %v52_v20 = vmul.f32 0.001953125, %v51_v19 }
  0xac   :  { %v60_v21 = vrot.slane %v52_v20, %v59_v18  ;;  %127 = vst.msk [vmem:[%s312_s4] sm:$0xf] %vm126_vm1, %v52_v20 }
  0xae   :  { %v62_v22 = vsub.f32 %v32_v0, %v60_v21  ;;  %v63_v23 = vsub.f32 %v33_v1, %v60_v21 }
  0xb0   :  { %v64_v24 = vmul.f32 %v62_v22, %v62_v22  ;;  %v65_v25 = vmul.f32 %v63_v23, %v63_v23 }
  0xb2   :  { %v68_v26 = vcombine.high %v64_v24, %v64_v24  ;;  %v69_v27 = vcombine.high %v65_v25, %v65_v25  ;;  %v72_v28 = vsel %vm40_vm0, %v64_v24, 0.0  ;;  %v73_v29 = vsel %vm40_vm0, %v65_v25, 0.0 }
  0xb3   :  { %v74_v30 = vadd.f32 %v73_v29, %v72_v28 }
  0xb4   :  { %v75_v31 = vsel %vm40_vm0, %v68_v26, 0.0  ;;  %v76_v32 = vsel %vm40_vm0, %v69_v27, 0.0 }
  0xb5   :  { %v77_v33 = vadd.f32 %v76_v32, %v75_v31  ;;  %v78_v34 = vsel %vm40_vm0, %v74_v30, 0.0 }
  0xb7   :  { %v79_v35 = vsel %vm40_vm0, %v77_v33, 0.0 }
  0xb8   :  { %v80_v36 = vadd.f32 %v79_v35, %v78_v34 }
  0xba   :  { %81 = vadd.xlane.f32.xlu0 %v80_v36 }
 0x147   :  { %v82_v38 = vpop.xlane.xlu0 %81 }
 0x148   :  { %v83_v39 = vmul.f32 0.001953125, %v82_v38 }
 0x14a   :  { %v84_v40 = vadd.f32 0.0009765625, %v83_v39 }
 0x14c   :  { %164 = vrsqrt.f32 %v84_v40  ;;  %vm87_vm2 = vcmp.eq.f32.partialorder %v84_v40, inf  ;;  %v90_v43 = vand.u32 2147483648, %v84_v40  ;;  %vm89_vm3 = vcmp.eq.f32.partialorder %v84_v40, 0.0 }
 0x156   :  { %v165_v41 = vpop.eup %164 }
 0x157   :  { %v86_v42 = vmul.f32 %v165_v41, %v84_v40 }
 0x159   :  { %v88_v44 = vsel %vm87_vm2, %v84_v40, %v86_v42 }
 0x15a   :  { %v91_v45 = vsel %vm89_vm3, %v90_v43, %v88_v44 }
 0x15b   :  { %166 = vrcp.f32 %v91_v45  ;;  %128 = vst.msk [vmem:[%s313_s5] sm:$0xf] %vm126_vm1, %v91_v45 }
 0x165   :  { %v167_v47 = vpop.eup %166 }
 0x166   :  { %v94_v48 = vmul.f32 %v167_v47, %v92_v46 }
 0x168   :  { %97 = vperm.xlu1 %160, %v94_v48  }
 0x16c   :  { %112 = vperm.xlu1 %160, %v109_v49  }
 0x1e7   :  { %v98_v50 = vpop.permute.xlu1 %97 }
 0x1e8   :  { %v105_v51 = vrot.slane %v98_v50, %v59_v18 }
 0x1ea   :  { %v107_v53 = vmul.f32 %v105_v51, %v62_v22  ;;  %v108_v54 = vmul.f32 %v105_v51, %v63_v23 }
 0x1eb   :  { %v113_v52 = vpop.permute.xlu1 %112 }
 0x1ec   :  { %v120_v55 = vrot.slane %v113_v52, %v59_v18 }
 0x1ee   :  { %v122_v56 = vadd.f32 %v120_v55, %v107_v53  ;;  %v123_v57 = vadd.f32 %v120_v55, %v108_v54 }
 0x1f0   :  { %124 = vst [vmem:[#allocation5] sm:$0xff] %v122_v56  ;;  %125 = vst [vmem:[#allocation5 + $0x8] sm:$0xff] %v123_v57 }
 0x1f1   :  { %201 = shalt.err (!%p198_p12)
}
 0x1f2   :  { %s202_s15 = scalar_lea.hbm %s311_s3, 256 }
 0x1f3   :  { %p203_p13 = scmp.ne.s32.totalorder %s311_s3, %s202_s15  ;;  %p206_p0 = scmp.lt.u32.totalorder %s202_s15, %s311_s3 }
 0x1f5   :  { %p208_p1 = pnand %p206_p0, %p203_p13 }
 0x1f7   :  { %211 = shalt.err (!%p208_p1)
}
 0x1f8   :  { %140 = dma.vmem_to_hbm [thread:$0]  %s135_s14, 256, %s311_s3, [#allocation4], %s217_s28, %s217_s28, %s218_s29  }
 0x1f9   :  { %214 = dma.done.wait [#allocation4], 256  }
 0x1fa   :  { %215 = vsyncadd [#allocation4], 4294967040 }
 0x1fb   :  { %152 = vsyncpa [#allocation3], 1 }
 0x1fc   :  { %153 = vsyncpa [#allocation4], 1 }

</bundles_post_ra>
